<compile_context>
chip_gen: v7x
topology: tpu7x:2x2x1
jax: 0.10.0
libtpu: 0.0.40
codegen_flags: <defaults>
</compile_context>

<pallas_src>
import functools

import numpy as np
import jax
import jax.numpy as jnp
from jax.experimental import pallas as pl
from jax.experimental.pallas import tpu as pltpu


# ----------------------------------------------------------------------------
# Host-side weight construction
# ----------------------------------------------------------------------------
def _dft_weights(seq_len, hidden, dtype):
    """Concatenated real/imag DFT weights, built in float64 and cast once.

    w1 = [Ch | Sh]  : (H, 2H)   stage 1:  x @ w1 = [x@Ch | x@Sh]
    w2 = [Cs | -Ss] : (S, 2S)   stage 2:  w2 @ [hc ; hs] = Re(D_s @ x @ D_h)
    """
    def cos_sin(n):
        k = np.arange(n)
        ang = 2.0 * np.pi * np.outer(k, k) / n
        return np.cos(ang), np.sin(ang)

    cos_h, sin_h = cos_sin(hidden)
    cos_s, sin_s = cos_sin(seq_len)
    w1 = np.concatenate([cos_h, sin_h], axis=1)        # (H, 2H)
    w2 = np.concatenate([cos_s, -sin_s], axis=1)       # (S, 2S)
    return jnp.asarray(w1, dtype=dtype), jnp.asarray(w2, dtype=dtype)


# ----------------------------------------------------------------------------
# VMEM budgeting / tile selection
# ----------------------------------------------------------------------------
def _vmem_capacity_bytes():
    try:
        cap = getattr(pltpu.get_tpu_info(), "vmem_capacity_bytes", None)
        if cap:
            return int(cap)
    except Exception:
        pass
    return 64 * 2 ** 20      # conservative default (v7x per-TensorCore VMEM)


def _vmem_estimate(bt, S, H, act_bytes, w_bytes):
    """Generous per-grid-step VMEM estimate in bytes."""
    io = 4 * bt * S * H * act_bytes                               # in+out, 2x buffered
    weights = 2 * ((H * 2 * H + S * 2 * S) * w_bytes + 2 * H * 4)  # assume 2 buffers
    interm = (bt * S * 2 * H * (4 + w_bytes)    # stage1 f32 + compute-dtype copy
              + bt * 2 * S * H * w_bytes        # [hc ; hs]
              + bt * S * 2 * S * w_bytes        # broadcast seq weights
              + 3 * bt * S * H * 4)             # fourier / y / centered (f32)
    return io + weights + interm


def _pick_batch_tile(batch, requested, fits):
    if requested is not None:
        assert batch % requested == 0
        return requested
    divisors = [d for d in range(min(batch, 16), 0, -1) if batch % d == 0]
    # Prefer >= 4 grid steps (>= 2 per TensorCore on v7x after the parallel
    # split) so the BlockSpec pipeline overlaps DMA with compute; relax only
    # when the batch is too small or VMEM forces a smaller tile.
    for min_steps in (4, 2, 1):
        for d in divisors:
            if batch // d >= min(min_steps, batch) and fits(d):
                return d
    return 1


# ----------------------------------------------------------------------------
# Kernel
# ----------------------------------------------------------------------------
def _fnet_fourier_kernel(x_ref, w1_ref, w2_ref, g_ref, b_ref, o_ref, *,
                         eps, compute_dtype):
    bt, S, H = x_ref.shape

    x = x_ref[...]                                    # (bt, S, H), input dtype
    xc = x.astype(compute_dtype)
    w1 = w1_ref[...]                                  # (H, 2H), compute dtype
    w2 = w2_ref[...]                                  # (S, 2S), compute dtype

    # Stage 1: hidden-axis DFT.  Batch tile folded into the matmul M dimension
    # (bt*S rows) for MXU fill; f32 accumulation on the MXU.
    stage1 = jnp.dot(xc.reshape(bt * S, H), w1,
                     preferred_element_type=jnp.float32)          # (bt*S, 2H)
    stage1 = stage1.reshape(bt, S, 2 * H).astype(compute_dtype)
    hc = stage1[:, :, :H]                             # x @ Cos_h
    hs = stage1[:, :, H:]                             # x @ Sin_h

    # Stage 2: seq-axis DFT as a single batched matmul with K = 2S:
    #   Re(D_s @ x @ D_h) = Cs @ hc - Ss @ hs = [Cs | -Ss] @ [hc ; hs]
    stacked = jnp.concatenate([hc, hs], axis=1)                    # (bt, 2S, H)
    w2b = jnp.broadcast_to(w2, (bt,) + w2.shape)                   # (bt, S, 2S)
    fourier = jnp.einsum("bst,bth->bsh", w2b, stacked,
                         preferred_element_type=jnp.float32)       # (bt, S, H)

    # Residual add + two-pass LayerNorm (all f32), vectorized over the tile.
    y = x.astype(jnp.float32) + fourier
    mean = jnp.mean(y, axis=-1, keepdims=True)
    centered = y - mean
    var = jnp.mean(centered * centered, axis=-1, keepdims=True)
    yn = centered * jax.lax.rsqrt(var + eps)

    gamma = g_ref[...].reshape(1, 1, H)
    beta = b_ref[...].reshape(1, 1, H)
    o_ref[...] = (yn * gamma + beta).astype(o_ref.dtype)


# ----------------------------------------------------------------------------
# Wrapper
# ----------------------------------------------------------------------------
def fnet_fourier_transform(hidden_states, gamma, beta, *, eps=1e-12,
                           batch_tile=None, compute_dtype=jnp.bfloat16):
    """hidden_states: [B, S, H] real.  Returns LayerNorm(x + Re(FFT2D(x)))."""
    B, S, H = hidden_states.shape
    w_dtype = jnp.dtype(compute_dtype)
    w1, w2 = _dft_weights(S, H, w_dtype)
    g2 = gamma.reshape(1, H).astype(jnp.float32)
    b2 = beta.reshape(1, H).astype(jnp.float32)

    act_bytes = jnp.dtype(hidden_states.dtype).itemsize
    w_bytes = w_dtype.itemsize
    budget = int(0.85 * _vmem_capacity_bytes())
    fits = lambda d: int(1.5 * _vmem_estimate(d, S, H, act_bytes, w_bytes)) <= budget
    bt = _pick_batch_tile(B, batch_tile, fits)
    est = _vmem_estimate(bt, S, H, act_bytes, w_bytes)
    vmem_limit = int(min(budget, max(32 * 2 ** 20, int(1.5 * est))))

    kernel = functools.partial(_fnet_fourier_kernel, eps=eps,
                               compute_dtype=compute_dtype)

    def build_and_run(single_buffer_consts):
        def const_spec(shape):
            nd = len(shape)
            imap = lambda i: (0,) * nd
            if single_buffer_consts:
                # Resident blocks (constant index_map): one buffer is enough.
                return pl.BlockSpec(shape, imap, pipeline_mode=pl.Buffered(1))
            return pl.BlockSpec(shape, imap)

        return pl.pallas_call(
            kernel,
            out_shape=jax.ShapeDtypeStruct((B, S, H), hidden_states.dtype),
            grid_spec=pltpu.PrefetchScalarGridSpec(
                num_scalar_prefetch=0,
                grid=(B // bt,),
                in_specs=[
                    pl.BlockSpec((bt, S, H), lambda i: (i, 0, 0)),  # activations
                    const_spec((H, 2 * H)),                         # [Ch | Sh]
                    const_spec((S, 2 * S)),                         # [Cs | -Ss]
                    const_spec((1, H)),                             # LN gamma
                    const_spec((1, H)),                             # LN beta
                ],
                out_specs=pl.BlockSpec((bt, S, H), lambda i: (i, 0, 0)),
            ),
            compiler_params=pltpu.CompilerParams(
                dimension_semantics=("parallel",),
                vmem_limit_bytes=vmem_limit),
        )(hidden_states, w1, w2, g2, b2)

    try:
        return build_and_run(True)
    except Exception:
        # pipeline_mode=pl.Buffered(1) not supported by this JAX version:
        # fall back to default (double-buffered) resident blocks.
        return build_and_run(False)

    # TODO(synk): the module's generic path (use_tpu_fourier_optimizations=False
    # or seq > 4096) uses complex fftn; this kernel realizes the equivalent
    # real-DFT matmul formulation, valid whenever both DFT matrices fit VMEM.


# ----------------------------------------------------------------------------
# Reference + harness
# ----------------------------------------------------------------------------
def reference_np(hidden_states, gamma, beta, eps=1e-12):
    """Float64 numpy reference: LayerNorm(x + Re(FFT2D(x)))."""
    x = np.asarray(hidden_states, dtype=np.float64)
    fourier = np.fft.fft2(x, axes=(1, 2)).real
    y = x + fourier
    mean = y.mean(-1, keepdims=True)
    var = ((y - mean) ** 2).mean(-1, keepdims=True)
    g = np.asarray(gamma, np.float64)
    b = np.asarray(beta, np.float64)
    return (y - mean) / np.sqrt(var + eps) * g + b


if __name__ == "__main__":
    # Small, lane-friendly config: batch=8, seq=8, hidden=128.
    B, S, H = 8, 8, 128
    eps = 1e-12

    key = jax.random.PRNGKey(0)
    k1, k2, k3 = jax.random.split(key, 3)
    hidden_states = jax.random.normal(k1, (B, S, H), dtype=jnp.float32)
    gamma = 1.0 + 0.02 * jax.random.normal(k2, (H,), dtype=jnp.float32)
    beta = 0.02 * jax.random.normal(k3, (H,), dtype=jnp.float32)

    ref = reference_np(hidden_states, gamma, beta, eps=eps)

    # f32-matmul path: tight check against the float64 FFT reference.
    out_f32 = jax.block_until_ready(
        fnet_fourier_transform(hidden_states, gamma, beta, eps=eps,
                               compute_dtype=jnp.float32))
    assert out_f32.shape == (B, S, H)
    np.testing.assert_allclose(np.asarray(out_f32, dtype=np.float64), ref,
                               atol=2e-4, rtol=2e-4)

    # Default production path (bf16 matmul operands, f32 accumulation / LN).
    out_bf16 = jax.block_until_ready(
        fnet_fourier_transform(hidden_states, gamma, beta, eps=eps))
    assert out_bf16.shape == (B, S, H) and out_bf16.dtype == hidden_states.dtype
    np.testing.assert_allclose(np.asarray(out_bf16, dtype=np.float64), ref,
                               atol=1.5e-1, rtol=5e-2)

    print("KERNEL_OK")
</pallas_src>

<mosaic_0001>
module attributes {stable_mosaic.version = 11 : i64} {
  func.func @_fnet_fourier_kernel(%arg0: i32, %arg1: memref<2x8x128xf32, #tpu.memory_space<vmem>>, %arg2: memref<128x256xf32, #tpu.memory_space<vmem>>, %arg3: memref<8x16xf32, #tpu.memory_space<vmem>>, %arg4: memref<1x128xf32, #tpu.memory_space<vmem>>, %arg5: memref<1x128xf32, #tpu.memory_space<vmem>>, %arg6: memref<2x8x128xf32, #tpu.memory_space<vmem>>) attributes {dimension_semantics = [#tpu.dimension_semantics<parallel>], iteration_bounds = array<i64: 4>, scalar_prefetch = 0 : i64, scratch_operands = 0 : i64, tpu.core_type = #tpu.core_type<tc>, window_params = [{transform_indices = @transform_0, window_bounds = array<i64: 2, 8, 128>}, {pipeline_mode = #tpu.pipeline_mode<synchronous>, transform_indices = @transform_1, window_bounds = array<i64: 128, 256>}, {pipeline_mode = #tpu.pipeline_mode<synchronous>, transform_indices = @transform_2, window_bounds = array<i64: 8, 16>}, {pipeline_mode = #tpu.pipeline_mode<synchronous>, transform_indices = @transform_3, window_bounds = array<i64: 1, 128>}, {pipeline_mode = #tpu.pipeline_mode<synchronous>, transform_indices = @transform_4, window_bounds = array<i64: 1, 128>}, {transform_indices = @transform_5, window_bounds = array<i64: 2, 8, 128>}]} {
    %c0 = arith.constant 0 : index
    %c0_0 = arith.constant 0 : index
    %c0_1 = arith.constant 0 : index
    %0 = vector.load %arg1[%c0, %c0_0, %c0_1] : memref<2x8x128xf32, #tpu.memory_space<vmem>>, vector<2x8x128xf32>
    %c0_2 = arith.constant 0 : index
    %c0_3 = arith.constant 0 : index
    %1 = vector.load %arg2[%c0_2, %c0_3] : memref<128x256xf32, #tpu.memory_space<vmem>>, vector<128x256xf32>
    %c0_4 = arith.constant 0 : index
    %c0_5 = arith.constant 0 : index
    %2 = vector.load %arg3[%c0_4, %c0_5] : memref<8x16xf32, #tpu.memory_space<vmem>>, vector<8x16xf32>
    %3 = vector.shape_cast %0 : vector<2x8x128xf32> to vector<16x128xf32>
    %cst = arith.constant dense<0.000000e+00> : vector<16x256xf32>
    %4 = tpu.matmul %3, %1, %cst {dimension_numbers = #tpu.dot_dimension_numbers<[1], [0], [0], [1], [0, 0, 1, 1], [], []>} : vector<16x128xf32>, vector<128x256xf32>, vector<16x256xf32> -> vector<16x256xf32>
    %5 = vector.shape_cast %4 : vector<16x256xf32> to vector<2x8x256xf32>
    %6 = vector.extract_strided_slice %5 {offsets = [0, 0, 0], sizes = [2, 8, 128], strides = [1, 1, 1]} : vector<2x8x256xf32> to vector<2x8x128xf32>
    %7 = vector.extract_strided_slice %5 {offsets = [0, 0, 128], sizes = [2, 8, 128], strides = [1, 1, 1]} : vector<2x8x256xf32> to vector<2x8x128xf32>
    %8 = tpu.concatenate %6, %7 in 1 : vector<2x8x128xf32>, vector<2x8x128xf32> -> vector<2x16x128xf32>
    %9 = vector.shape_cast %2 : vector<8x16xf32> to vector<1x8x16xf32>
    %10 = vector.broadcast %9 : vector<1x8x16xf32> to vector<2x8x16xf32>
    "tpu.trace_start"() <{level = 10 : i32, message = "bst,bth->bsh"}> : () -> ()
    %cst_6 = arith.constant dense<0.000000e+00> : vector<2x8x128xf32>
    %11 = tpu.matmul %10, %8, %cst_6 {dimension_numbers = #tpu.dot_dimension_numbers<[2], [1], [1], [2], [0, 0, 0, 1, 1, 2], [0], [0]>} : vector<2x8x16xf32>, vector<2x16x128xf32>, vector<2x8x128xf32> -> vector<2x8x128xf32>
    "tpu.trace_stop"() : () -> ()
    %12 = arith.addf %0, %11 : vector<2x8x128xf32>
    %cst_7 = arith.constant dense<0.000000e+00> : vector<2x8xf32>
    %13 = vector.multi_reduction <add>, %12, %cst_7 [2] : vector<2x8x128xf32> to vector<2x8xf32>
    %14 = vector.shape_cast %13 : vector<2x8xf32> to vector<2x8x1xf32>
    %cst_8 = arith.constant 1.280000e+02 : f32
    %15 = vector.broadcast %cst_8 : f32 to vector<2x8x1xf32>
    %16 = arith.divf %14, %15 : vector<2x8x1xf32>
    %17 = vector.broadcast %16 : vector<2x8x1xf32> to vector<2x8x128xf32>
    %18 = arith.subf %12, %17 : vector<2x8x128xf32>
    %19 = arith.mulf %18, %18 : vector<2x8x128xf32>
    %cst_9 = arith.constant dense<0.000000e+00> : vector<2x8xf32>
    %20 = vector.multi_reduction <add>, %19, %cst_9 [2] : vector<2x8x128xf32> to vector<2x8xf32>
    %21 = vector.shape_cast %20 : vector<2x8xf32> to vector<2x8x1xf32>
    %cst_10 = arith.constant 1.280000e+02 : f32
    %22 = vector.broadcast %cst_10 : f32 to vector<2x8x1xf32>
    %23 = arith.divf %21, %22 : vector<2x8x1xf32>
    %cst_11 = arith.constant 9.99999996E-13 : f32
    %24 = vector.broadcast %cst_11 : f32 to vector<2x8x1xf32>
    %25 = arith.addf %23, %24 : vector<2x8x1xf32>
    %26 = math.rsqrt %25 : vector<2x8x1xf32>
    %27 = vector.broadcast %26 : vector<2x8x1xf32> to vector<2x8x128xf32>
    %28 = arith.mulf %18, %27 : vector<2x8x128xf32>
    %c0_12 = arith.constant 0 : index
    %c0_13 = arith.constant 0 : index
    %29 = vector.load %arg4[%c0_12, %c0_13] : memref<1x128xf32, #tpu.memory_space<vmem>>, vector<1x128xf32>
    %30 = vector.shape_cast %29 : vector<1x128xf32> to vector<1x1x128xf32>
    %c0_14 = arith.constant 0 : index
    %c0_15 = arith.constant 0 : index
    %31 = vector.load %arg5[%c0_14, %c0_15] : memref<1x128xf32, #tpu.memory_space<vmem>>, vector<1x128xf32>
    %32 = vector.shape_cast %31 : vector<1x128xf32> to vector<1x1x128xf32>
    %33 = vector.broadcast %30 : vector<1x1x128xf32> to vector<2x8x128xf32>
    %34 = arith.mulf %28, %33 : vector<2x8x128xf32>
    %35 = vector.broadcast %32 : vector<1x1x128xf32> to vector<2x8x128xf32>
    %36 = arith.addf %34, %35 : vector<2x8x128xf32>
    %c0_16 = arith.constant 0 : index
    %c0_17 = arith.constant 0 : index
    %c0_18 = arith.constant 0 : index
    %37 = vector.load %arg6[%c0_16, %c0_17, %c0_18] : memref<2x8x128xf32, #tpu.memory_space<vmem>>, vector<2x8x128xf32>
    tpu.vector_store %arg6[%c0_16, %c0_17, %c0_18], %36 {strides = array<i32>} : memref<2x8x128xf32, #tpu.memory_space<vmem>>, vector<2x8x128xf32>,
    return
  }
  func.func @transform_0(%arg0: i32) -> (i32, i32, i32) {
    %c0_i32 = arith.constant 0 : i32
    %c0_i32_0 = arith.constant 0 : i32
    %c0_i32_1 = arith.constant 0 : i32
    return %arg0, %c0_i32, %c0_i32_0 : i32, i32, i32
  }
  func.func @transform_1(%arg0: i32) -> (i32, i32) {
    %c0_i32 = arith.constant 0 : i32
    %c0_i32_0 = arith.constant 0 : i32
    %c0_i32_1 = arith.constant 0 : i32
    return %c0_i32, %c0_i32_0 : i32, i32
  }
  func.func @transform_2(%arg0: i32) -> (i32, i32) {
    %c0_i32 = arith.constant 0 : i32
    %c0_i32_0 = arith.constant 0 : i32
    %c0_i32_1 = arith.constant 0 : i32
    return %c0_i32, %c0_i32_0 : i32, i32
  }
  func.func @transform_3(%arg0: i32) -> (i32, i32) {
    %c0_i32 = arith.constant 0 : i32
    %c0_i32_0 = arith.constant 0 : i32
    %c0_i32_1 = arith.constant 0 : i32
    return %c0_i32, %c0_i32_0 : i32, i32
  }
  func.func @transform_4(%arg0: i32) -> (i32, i32) {
    %c0_i32 = arith.constant 0 : i32
    %c0_i32_0 = arith.constant 0 : i32
    %c0_i32_1 = arith.constant 0 : i32
    return %c0_i32, %c0_i32_0 : i32, i32
  }
  func.func @transform_5(%arg0: i32) -> (i32, i32, i32) {
    %c0_i32 = arith.constant 0 : i32
    %c0_i32_0 = arith.constant 0 : i32
    %c0_i32_1 = arith.constant 0 : i32
    return %arg0, %c0_i32, %c0_i32_0 : i32, i32, i32
  }
}

module attributes {stable_mosaic.version = 11 : i64} {
  func.func @_fnet_fourier_kernel(%arg0: i32, %arg1: memref<2x8x128xf32, #tpu.memory_space<vmem>>, %arg2: memref<128x256xf32, #tpu.memory_space<vmem>>, %arg3: memref<8x16xf32, #tpu.memory_space<vmem>>, %arg4: memref<1x128xf32, #tpu.memory_space<vmem>>, %arg5: memref<1x128xf32, #tpu.memory_space<vmem>>, %arg6: memref<2x8x128xf32, #tpu.memory_space<vmem>>) attributes {dimension_semantics = [#tpu.dimension_semantics<parallel>], iteration_bounds = array<i64: 4>, scalar_prefetch = 0 : i64, scratch_operands = 0 : i64, tpu.core_type = #tpu.core_type<tc>, window_params = [{transform_indices = @transform_0, window_bounds = array<i64: 2, 8, 128>}, {pipeline_mode = #tpu.pipeline_mode<synchronous>, transform_indices = @transform_1, window_bounds = array<i64: 128, 256>}, {pipeline_mode = #tpu.pipeline_mode<synchronous>, transform_indices = @transform_2, window_bounds = array<i64: 8, 16>}, {pipeline_mode = #tpu.pipeline_mode<synchronous>, transform_indices = @transform_3, window_bounds = array<i64: 1, 128>}, {pipeline_mode = #tpu.pipeline_mode<synchronous>, transform_indices = @transform_4, window_bounds = array<i64: 1, 128>}, {transform_indices = @transform_5, window_bounds = array<i64: 2, 8, 128>}]} {
    %c0 = arith.constant 0 : index
    %c0_0 = arith.constant 0 : index
    %c0_1 = arith.constant 0 : index
    %0 = vector.load %arg1[%c0, %c0_0, %c0_1] : memref<2x8x128xf32, #tpu.memory_space<vmem>>, vector<2x8x128xf32>
    %c0_2 = arith.constant 0 : index
    %c0_3 = arith.constant 0 : index
    %1 = vector.load %arg2[%c0_2, %c0_3] : memref<128x256xf32, #tpu.memory_space<vmem>>, vector<128x256xf32>
    %c0_4 = arith.constant 0 : index
    %c0_5 = arith.constant 0 : index
    %2 = vector.load %arg3[%c0_4, %c0_5] : memref<8x16xf32, #tpu.memory_space<vmem>>, vector<8x16xf32>
    %3 = vector.shape_cast %0 : vector<2x8x128xf32> to vector<16x128xf32>
    %cst = arith.constant dense<0.000000e+00> : vector<16x256xf32>
    %4 = tpu.matmul %3, %1, %cst {dimension_numbers = #tpu.dot_dimension_numbers<[1], [0], [0], [1], [0, 0, 1, 1], [], []>} : vector<16x128xf32>, vector<128x256xf32>, vector<16x256xf32> -> vector<16x256xf32>
    %5 = vector.shape_cast %4 : vector<16x256xf32> to vector<2x8x256xf32>
    %6 = vector.extract_strided_slice %5 {offsets = [0, 0, 0], sizes = [2, 8, 128], strides = [1, 1, 1]} : vector<2x8x256xf32> to vector<2x8x128xf32>
    %7 = vector.extract_strided_slice %5 {offsets = [0, 0, 128], sizes = [2, 8, 128], strides = [1, 1, 1]} : vector<2x8x256xf32> to vector<2x8x128xf32>
    %8 = tpu.concatenate %6, %7 in 1 : vector<2x8x128xf32>, vector<2x8x128xf32> -> vector<2x16x128xf32>
    %9 = vector.shape_cast %2 : vector<8x16xf32> to vector<1x8x16xf32>
    %10 = vector.broadcast %9 : vector<1x8x16xf32> to vector<2x8x16xf32>
    "tpu.trace_start"() <{level = 10 : i32, message = "bst,bth->bsh"}> : () -> ()
    %cst_6 = arith.constant dense<0.000000e+00> : vector<2x8x128xf32>
    %11 = tpu.matmul %10, %8, %cst_6 {dimension_numbers = #tpu.dot_dimension_numbers<[2], [1], [1], [2], [0, 0, 0, 1, 1, 2], [0], [0]>} : vector<2x8x16xf32>, vector<2x16x128xf32>, vector<2x8x128xf32> -> vector<2x8x128xf32>
    "tpu.trace_stop"() : () -> ()
    %12 = arith.addf %0, %11 : vector<2x8x128xf32>
    %cst_7 = arith.constant dense<0.000000e+00> : vector<2x8xf32>
    %13 = vector.multi_reduction <add>, %12, %cst_7 [2] : vector<2x8x128xf32> to vector<2x8xf32>
    %14 = vector.shape_cast %13 : vector<2x8xf32> to vector<2x8x1xf32>
    %cst_8 = arith.constant 1.280000e+02 : f32
    %15 = vector.broadcast %cst_8 : f32 to vector<2x8x1xf32>
    %16 = arith.divf %14, %15 : vector<2x8x1xf32>
    %17 = vector.broadcast %16 : vector<2x8x1xf32> to vector<2x8x128xf32>
    %18 = arith.subf %12, %17 : vector<2x8x128xf32>
    %19 = arith.mulf %18, %18 : vector<2x8x128xf32>
    %cst_9 = arith.constant dense<0.000000e+00> : vector<2x8xf32>
    %20 = vector.multi_reduction <add>, %19, %cst_9 [2] : vector<2x8x128xf32> to vector<2x8xf32>
    %21 = vector.shape_cast %20 : vector<2x8xf32> to vector<2x8x1xf32>
    %cst_10 = arith.constant 1.280000e+02 : f32
    %22 = vector.broadcast %cst_10 : f32 to vector<2x8x1xf32>
    %23 = arith.divf %21, %22 : vector<2x8x1xf32>
    %cst_11 = arith.constant 9.99999996E-13 : f32
    %24 = vector.broadcast %cst_11 : f32 to vector<2x8x1xf32>
    %25 = arith.addf %23, %24 : vector<2x8x1xf32>
    %26 = math.rsqrt %25 : vector<2x8x1xf32>
    %27 = vector.broadcast %26 : vector<2x8x1xf32> to vector<2x8x128xf32>
    %28 = arith.mulf %18, %27 : vector<2x8x128xf32>
    %c0_12 = arith.constant 0 : index
    %c0_13 = arith.constant 0 : index
    %29 = vector.load %arg4[%c0_12, %c0_13] : memref<1x128xf32, #tpu.memory_space<vmem>>, vector<1x128xf32>
    %30 = vector.shape_cast %29 : vector<1x128xf32> to vector<1x1x128xf32>
    %c0_14 = arith.constant 0 : index
    %c0_15 = arith.constant 0 : index
    %31 = vector.load %arg5[%c0_14, %c0_15] : memref<1x128xf32, #tpu.memory_space<vmem>>, vector<1x128xf32>
    %32 = vector.shape_cast %31 : vector<1x128xf32> to vector<1x1x128xf32>
    %33 = vector.broadcast %30 : vector<1x1x128xf32> to vector<2x8x128xf32>
    %34 = arith.mulf %28, %33 : vector<2x8x128xf32>
    %35 = vector.broadcast %32 : vector<1x1x128xf32> to vector<2x8x128xf32>
    %36 = arith.addf %34, %35 : vector<2x8x128xf32>
    %c0_16 = arith.constant 0 : index
    %c0_17 = arith.constant 0 : index
    %c0_18 = arith.constant 0 : index
    %37 = vector.load %arg6[%c0_16, %c0_17, %c0_18] : memref<2x8x128xf32, #tpu.memory_space<vmem>>, vector<2x8x128xf32>
    tpu.vector_store %arg6[%c0_16, %c0_17, %c0_18], %36 {strides = array<i32>} : memref<2x8x128xf32, #tpu.memory_space<vmem>>, vector<2x8x128xf32>,
    return
  }
  func.func @transform_0(%arg0: i32) -> (i32, i32, i32) {
    %c0_i32 = arith.constant 0 : i32
    %c0_i32_0 = arith.constant 0 : i32
    %c0_i32_1 = arith.constant 0 : i32
    return %arg0, %c0_i32, %c0_i32_0 : i32, i32, i32
  }
  func.func @transform_1(%arg0: i32) -> (i32, i32) {
    %c0_i32 = arith.constant 0 : i32
    %c0_i32_0 = arith.constant 0 : i32
    %c0_i32_1 = arith.constant 0 : i32
    return %c0_i32, %c0_i32_0 : i32, i32
  }
  func.func @transform_2(%arg0: i32) -> (i32, i32) {
    %c0_i32 = arith.constant 0 : i32
    %c0_i32_0 = arith.constant 0 : i32
    %c0_i32_1 = arith.constant 0 : i32
    return %c0_i32, %c0_i32_0 : i32, i32
  }
  func.func @transform_3(%arg0: i32) -> (i32, i32) {
    %c0_i32 = arith.constant 0 : i32
    %c0_i32_0 = arith.constant 0 : i32
    %c0_i32_1 = arith.constant 0 : i32
    return %c0_i32, %c0_i32_0 : i32, i32
  }
  func.func @transform_4(%arg0: i32) -> (i32, i32) {
    %c0_i32 = arith.constant 0 : i32
    %c0_i32_0 = arith.constant 0 : i32
    %c0_i32_1 = arith.constant 0 : i32
    return %c0_i32, %c0_i32_0 : i32, i32
  }
  func.func @transform_5(%arg0: i32) -> (i32, i32, i32) {
    %c0_i32 = arith.constant 0 : i32
    %c0_i32_0 = arith.constant 0 : i32
    %c0_i32_1 = arith.constant 0 : i32
    return %arg0, %c0_i32, %c0_i32_0 : i32, i32, i32
  }
}

</mosaic_0001>

<bundles_post_ra>
// kernel: tpu_custom_call.1
= control target key start
LH: loop header
LB: loop body
LE: loop exit
PB: predicated region body
PF: predicated region fallthrough
CT: control target
= control target key end

     0   :  { %10 = vsyncpa [#allocation3], 0  ;;  %s1285_s0 = inlined_call_operand.hbm [shape: f32[8,8,128], index: 0, kind: input, shape index: {}]   ;;  %s1286_s1 = inlined_call_operand.hbm [shape: f32[128,256], index: 1, kind: input, shape index: {}]   ;;  %s1287_s2 = inlined_call_operand.hbm [shape: f32[8,16], index: 2, kind: input, shape index: {}]   ;;  %s1288_s3 = inlined_call_operand.vmem [shape: f32[1,128], index: 3, kind: input, shape index: {}]   ;;  %s1289_s4 = inlined_call_operand.vmem [shape: f32[1,128], index: 4, kind: input, shape index: {}]   ;;  %s1290_s5 = inlined_call_operand.hbm [shape: f32[8,8,128], index: 5, kind: output, shape index: {}]  }
   0x1   :  { %12 = vsyncpa [#allocation3 + $0x1], 0 }
   0x2   :  { %13 = vsyncpa [#allocation6], 0 }
   0x3   :  { %14 = vsyncpa [#allocation4], 0 }
   0x4   :  { %16 = vsyncpa [#allocation4 + $0x1], 0  ;;  %s1042_s18 = smov 0   ;;  %s1044_s19 = smov 0  }
   0x5   :  { %s1046_s20 = smov 0   ;;  %s1048_s21 = smov 0  }
   0x6 LB: > { %s1063_s22 = sadd.s32 4294967295, %s997_s21   ;;  %s679_s23 = sadd.s32 4294967294, %s997_s21   ;;  %s997_s21 = sphi %s1048_s21, %s1309_s21   ;;  %s993_s20 = sphi %s1046_s20, %s1308_s20   ;;  %s989_s19 = sphi %s1044_s19, %s1307_s19   ;;  %s985_s18 = sphi %s1042_s18, %s1306_s18  }
   0x7   : > { %p42_p0 = scmp.ne.s32.totalorder %s989_s19, %s985_s18  ;;  %p1291_p1 = scmp.eq.s32.totalorder %s1063_s22, 0 }
   0x8   : > { %p156_p3 = scmp.eq.s32.totalorder %s679_s23, 3  ;;  %p680_p5 = scmp.ge.s32.totalorder %s997_s21, 1 }
   0x9   : > { %p1072_p4 = por %p1291_p1, %p42_p0  ;;  %p163_p7 = scmp.lt.s32.totalorder %s997_s21, 5 }
   0xa   : > { %p1077_p6 = por %p156_p3, %p42_p0  ;;  %s999_s27 = smov [#allocation5]  }
   0xb   : > { %s1294_s24 = scalar_select %p1072_p4, 1, 0 }
   0xc   : > { %s1295_s25 = scalar_select %p1077_p6, 1, 0 }
   0xd   : > { %p1082_p8 = pnand %p680_p5, %p163_p7  ;;  %s175_s28 = sshll.u32 %s999_s27, 4  ;;  %s176_s28 = int_to_ptr.vmem [resolvable:$true] %s175_s28 }
   0xe   : > { %s1000_s30 = smov [#allocation7]   ;;  %s841_s9 = scalar_lea.hbm %s1286_s1, 4096 }
   0xf   : > { %s1296_s26 = scalar_select %p1082_p8, 1, 0 }
  0x10   : > { %p773_p9 = pneg %p1082_p8  ;;  %s189_s6 = sshll.u32 %s1000_s30, 4  ;;  %s1094_s6 = int_to_ptr.vmem [resolvable:$true] %s189_s6 }
  0x11   : > { %p842_p11 = scmp.ne.s32.totalorder %s1286_s1, %s841_s9  ;;  %p848_p3 = scmp.lt.u32.totalorder %s841_s9, %s1286_s1 }
  0x12   : > { %p1090_p10 = pnand %p773_p9, %p1291_p1 }
  0x14   : > { %p843_p12 = pneg %p1090_p10 }
  0x16   : > { %p844_p13 = pnand %p843_p12, %p842_p11 }
  0x18   : > { %p845_p0 = pneg %p844_p13 }
  0x1a   : > { %p850_p5 = pnand %p848_p3, %p845_p0 }
  0x1c   : > { %853 = shalt.err (!%p850_p5)
}
  0x1d   : > { %s854_s14 = scalar_lea.vmem %s176_s28, 4096  ;;  %p862_p2 = scmp.lt.s32.totalorder %s176_s28, %s176_s28 }
  0x1e   : > { %p855_p7 = scmp.ne.s32.totalorder %s176_s28, %s854_s14  ;;  %p863_p6 = scmp.lt.s32.totalorder %s854_s14, %s854_s14 }
  0x20   : > { %p857_p9 = pnand %p855_p7, %p843_p12  ;;  %p864_p4 = por %p863_p6, %p862_p2 }
  0x22   : > { %p858_p1 = pneg %p857_p9 }
  0x24   : > { %p865_p8 = pnand %p864_p4, %p858_p1 }
  0x26   : > { %868 = shalt.err (!%p865_p8)
}
  0x27   : > { %s1001_s15 = smov 256   ;;  %s1002_s16 = smov 16  }
  0x28   : > { %776 = dma.hbm_to_vmem [thread:$0]  (!%p1090_p10), %s1286_s1, 4096, %s176_s28, [#allocation6], %s1001_s15, %s1001_s15, %s1002_s16  }
  0x29   : > { %s869_s7 = scalar_lea.hbm %s1287_s2, 128 }
  0x2a   : > { %p870_p11 = scmp.ne.s32.totalorder %s1287_s2, %s869_s7  ;;  %p876_p4 = scmp.lt.u32.totalorder %s869_s7, %s1287_s2 }
  0x2c   : > { %p872_p1 = pnand %p870_p11, %p843_p12 }
  0x2e   : > { %p873_p2 = pneg %p872_p1 }
  0x30   : > { %p878_p6 = pnand %p876_p4, %p873_p2 }
  0x32   : > { %881 = shalt.err (!%p878_p6)
}
  0x33   : > { %s882_s28 = scalar_lea.vmem %s1094_s6, 128  ;;  %p890_p3 = scmp.lt.s32.totalorder %s1094_s6, %s1094_s6 }
  0x34   : > { %p883_p8 = scmp.ne.s32.totalorder %s1094_s6, %s882_s28  ;;  %p891_p5 = scmp.lt.s32.totalorder %s882_s28, %s882_s28 }
  0x36   : > { %p885_p13 = pnand %p883_p8, %p843_p12  ;;  %p892_p7 = por %p891_p5, %p890_p3 }
  0x38   : > { %p886_p0 = pneg %p885_p13 }
  0x3a   : > { %p893_p9 = pnand %p892_p7, %p886_p0 }
  0x3c   : > { %896 = shalt.err (!%p893_p9)
}
  0x3d   : > { %779 = dma.hbm_to_vmem [thread:$0]  (!%p1090_p10), %s1287_s2, 128, %s1094_s6, [#allocation6]  }
  0x3e   : > { %s1144_s14 = sadd.s32 1, %s997_s21   ;;  %s29_s29 = sadd.s32 1, %s993_s20 }
  0x3f   : > { %s26_s15 = ssub.s32 %s997_s21, %s1144_s14  ;;  %p36_p12 = scmp.ne.s32.totalorder %s993_s20, %s989_s19 }
  0x40   : > { %p27_p11 = scmp.eq.s32.totalorder %s26_s15, 0  ;;  %p37_p1 = scmp.eq.s32.totalorder %s997_s21, 0 }
  0x41   : > { %p1298_p2 = scmp.eq.s32.totalorder %s1063_s22, 3  ;;  %p790_p6 = scmp.lt.s32.totalorder %s997_s21, 4 }
  0x42   : > { %s1160_s17 = scalar_select %p27_p11, %s993_s20, %s29_s29  }
  0x43   : > { %p1154_p4 = por %p1298_p2, %p36_p12  ;;  %p38_p8 = por %p37_p1, %p36_p12 }
  0x44   : > { %s206_s23 = sand.u32 1, %s993_s20   ;;  %s701_s6 = sshll.u32 %s997_s21, 8 }
  0x45   : > { %s684_s27 = sshll.u32 %s206_s23, 4  ;;  %s1167_s8 = scalar_lea.hbm %s1285_s0, %s701_s6 }
  0x46   : > { %s210_s9 = scalar_lea.vmem [#allocation2], %s684_s27  ;;  %p1171_p10 = pnand %p790_p6, %p38_p8 }
  0x47   : > { %s217_s10 = sshll.u32 %s210_s9, 4  ;;  %s1175_s28 = scalar_lea.sflag [#allocation3], %s206_s23  ;;  %s1169_s10 = int_to_ptr.vmem [resolvable:$true] %s217_s10 }
  0x48   : > { %s897_s12 = scalar_lea.hbm %s1167_s8, 256  ;;  %p899_p0 = pneg %p1171_p10 }
  0x49   : > { %p898_p13 = scmp.ne.s32.totalorder %s1167_s8, %s897_s12  ;;  %s902_s15 = scalar_lea.hbm %s1285_s0, 1024 }
  0x4a   : > { %p903_p7 = scmp.lt.u32.totalorder %s1167_s8, %s1285_s0  ;;  %p904_p9 = scmp.lt.u32.totalorder %s902_s15, %s897_s12 }
  0x4b   : > { %p900_p3 = pnand %p899_p0, %p898_p13  ;;  %p906_p11 = scmp.lt.u32.totalorder %s897_s12, %s1167_s8 }
  0x4c   : > { %p905_p12 = por %p904_p9, %p903_p7 }
  0x4d   : > { %p901_p5 = pneg %p900_p3 }
  0x4e   : > { %p907_p1 = por %p906_p11, %p905_p12 }
  0x50   : > { %p908_p2 = pnand %p907_p1, %p901_p5 }
  0x52   : > { %911 = shalt.err (!%p908_p2)
}
  0x53   : > { %s912_s23 = scalar_lea.vmem %s1169_s10, 256  ;;  %s1003_s30 = smov [#allocation2]  }
  0x54   : > { %p913_p6 = scmp.ne.s32.totalorder %s1169_s10, %s912_s23  ;;  %s917_s7 = sshll.u32 %s1003_s30, 4  ;;  %s918_s7 = int_to_ptr.vmem [resolvable:$false] %s917_s7 }
  0x55   : > { %s919_s9 = scalar_lea.vmem %s918_s7, 512  ;;  %p920_p3 = scmp.lt.s32.totalorder %s1169_s10, %s918_s7 }
  0x56   : > { %p915_p8 = pnand %p913_p6, %p899_p0  ;;  %p921_p7 = scmp.lt.s32.totalorder %s919_s9, %s912_s23 }
  0x58   : > { %p916_p13 = pneg %p915_p8  ;;  %p922_p9 = por %p921_p7, %p920_p3 }
  0x5a   : > { %p923_p12 = pnand %p922_p9, %p916_p13 }
  0x5c   : > { %926 = shalt.err (!%p923_p12)
}
  0x5d   : > { %s1004_s12 = smov 128   ;;  %s1005_s13 = smov 8  }
  0x5e   : > { %783 = dma.hbm_to_vmem [thread:$0]  (!%p1171_p10), %s1167_s8, 256, %s1169_s10, %s1175_s28, %s1004_s12, %s1004_s12, %s1005_s13  }
  0x5f   : > { %p1301_p0 = scmp.ne.s32.totalorder %s1296_s26, 0 }
  0x60   : > { %s1206_s29 = sand.u32 (!%p1301_p0), 1, %s989_s19   ;;  %p1302_p5 = scmp.ne.s32.totalorder (!%p1301_p0), %s1294_s24, 0 }
  0x61   : > { %229 = sbr.rel (%p1301_p0) target bundleno = 905 (0x389), region = 40  ;;  %s688_s15 = sshll.u32 (!%p1301_p0), %s1206_s29, 4 }
  0x62   : > { %s232_s27 = scalar_lea.sflag (!%p1301_p0), [#allocation3], %s1206_s29  ;;  %s1212_s6 = scalar_lea.vmem (!%p1301_p0), [#allocation2], %s688_s15 }
  0x68   : > { %972 = dma.done.wait (%p1302_p5), %s232_s27, 256  }
  0x69   : > { %974 = vsyncadd (%p1302_p5), %s232_s27, 4294967040  ;;  %p1303_p10 = scmp.eq.s32.totalorder %s1063_s22, 0 }
  0x6b   : > { %976 = dma.done.wait (%p1303_p10), [#allocation6], 4224   ;;  %p1304_p11 = pmov %p1303_p10 }
  0x6c   : > { %v1006_v0 = vmov 0.0   ;;  %v275_v1 = vld [vmem:[#allocation5 + $0x8] sm:$0xff]  ;;  %v277_v2 = vld [vmem:[#allocation5 + $0x18] sm:$0xff]  ;;  %v274_v3 = vld [vmem:[#allocation5] sm:$0xff]  ;;  %v1007_v51 = vmov 0.0|0.0   ;;  %vm1008_vm0 = vmmov 0  }
  0x6d   : > { %978 = vsyncadd (%p1304_p11), [#allocation6], 4294963072  ;;  %371 = vmatprep.mubr.f32.mxu0 %v1006_v0  ;;  %v723_v4 = vpack.c.bf16 %v277_v2, %v275_v1  ;;  %v276_v5 = vld [vmem:[#allocation5 + $0x10] sm:$0xff]  ;;  %v279_v6 = vld [vmem:[#allocation5 + $0x28] sm:$0xff]  ;;  %755 = vmatprep.subr.bf16.mxu1 %v1007_v51  ;;  %vm384_vm1 = vcmask 130048   ;;  %s702_s11 = sshll.u32 %s1063_s22, 8 }
  0x6e   : > { %v281_v7 = vld [vmem:[#allocation5 + $0x38] sm:$0xff]  ;;  %v725_v8 = vpack.c.bf16 %v276_v5, %v274_v3  ;;  %v278_v10 = vld [vmem:[#allocation5 + $0x20] sm:$0xff]  ;;  %v280_v11 = vld [vmem:[#allocation5 + $0x30] sm:$0xff]  ;;  %713 = vmatprep.mubr.msk.f32.mxu1 %vm1008_vm0, %v1006_v0  ;;  %s269_s28 = scalar_lea.vmem [#allocation8], %s688_s15  ;;  %s1240_s9 = scalar_lea.hbm %s1290_s5, %s702_s11 }
  0x6f   : > { %v727_v9 = vpack.c.bf16 %v281_v7, %v279_v6  ;;  %v283_v12 = vld [vmem:[#allocation5 + $0x48] sm:$0xff]  ;;  %724 = vmatprep.subr.bf16.mxu0 %v723_v4  ;;  %v285_v13 = vld [vmem:[#allocation5 + $0x58] sm:$0xff]  ;;  %v729_v14 = vpack.c.bf16 %v280_v11, %v278_v10  ;;  %v282_v16 = vld [vmem:[#allocation5 + $0x40] sm:$0xff]  ;;  %s587_s23 = sshll.u32 %s269_s28, 4  ;;  %s574_s12 = scalar_lea.sflag [#allocation4], %s1206_s29  ;;  %s1242_s23 = int_to_ptr.vmem [resolvable:$true] %s587_s23 }
  0x70   : > { %726 = vmatpush1.bf16.msra.mxu0 %v725_v8  ;;  %v731_v15 = vpack.c.bf16 %v285_v13, %v283_v12  ;;  %v284_v17 = vld [vmem:[#allocation5 + $0x50] sm:$0xff]  ;;  %v287_v18 = vld [vmem:[#allocation5 + $0x68] sm:$0xff]  ;;  %v289_v19 = vld [vmem:[#allocation5 + $0x78] sm:$0xff]  ;;  %s927_s13 = scalar_lea.vmem %s1242_s23, 256  ;;  %s1009_s22 = smov [#allocation8]  }
  0x71   : > { %728 = vmatprep.subr.bf16.mxu0 %v727_v9  ;;  %v733_v20 = vpack.c.bf16 %v284_v17, %v282_v16  ;;  %v735_v21 = vpack.c.bf16 %v289_v19, %v287_v18  ;;  %v286_v22 = vld [vmem:[#allocation5 + $0x60] sm:$0xff]  ;;  %v288_v23 = vld [vmem:[#allocation5 + $0x70] sm:$0xff]  ;;  %v291_v24 = vld [vmem:[#allocation5 + $0x88] sm:$0xff]  ;;  %p928_p1 = scmp.ne.s32.totalorder %s1242_s23, %s927_s13  ;;  %s931_s15 = sshll.u32 %s1009_s22, 4  ;;  %s932_s15 = int_to_ptr.vmem [resolvable:$false] %s931_s15 }
  0x72   : > { %v293_v25 = vld [vmem:[#allocation5 + $0x98] sm:$0xff]  ;;  %v737_v26 = vpack.c.bf16 %v288_v23, %v286_v22  ;;  %v290_v28 = vld [vmem:[#allocation5 + $0x80] sm:$0xff]  ;;  %v292_v29 = vld [vmem:[#allocation5 + $0x90] sm:$0xff]  ;;  %s933_s27 = scalar_lea.vmem %s932_s15, 512  ;;  %p934_p8 = scmp.lt.s32.totalorder %s1242_s23, %s932_s15 }
  0x73   : > { %v739_v27 = vpack.c.bf16 %v293_v25, %v291_v24  ;;  %v295_v30 = vld [vmem:[#allocation5 + $0xa8] sm:$0xff]  ;;  %v297_v31 = vld [vmem:[#allocation5 + $0xb8] sm:$0xff]  ;;  %v741_v32 = vpack.c.bf16 %v292_v29, %v290_v28  ;;  %v294_v34 = vld [vmem:[#allocation5 + $0xa0] sm:$0xff]  ;;  %p929_p2 = pnand %p928_p1, %p1154_p4  ;;  %p935_p13 = scmp.lt.s32.totalorder %s933_s27, %s927_s13 }
  0x74   : > { %730 = vmatpush1.bf16.msra.mxu0 %v729_v14  ;;  %v743_v33 = vpack.c.bf16 %v297_v31, %v295_v30  ;;  %v296_v35 = vld [vmem:[#allocation5 + $0xb0] sm:$0xff]  ;;  %v299_v36 = vld [vmem:[#allocation5 + $0xc8] sm:$0xff]  ;;  %v301_v37 = vld [vmem:[#allocation5 + $0xd8] sm:$0xff] }
  0x75   : > { %732 = vmatprep.subr.bf16.mxu0 %v731_v15  ;;  %v745_v38 = vpack.c.bf16 %v296_v35, %v294_v34  ;;  %v747_v39 = vpack.c.bf16 %v301_v37, %v299_v36  ;;  %v298_v40 = vld [vmem:[#allocation5 + $0xc0] sm:$0xff]  ;;  %v300_v41 = vld [vmem:[#allocation5 + $0xd0] sm:$0xff]  ;;  %v303_v42 = vld [vmem:[#allocation5 + $0xe8] sm:$0xff]  ;;  %p930_p6 = pneg %p929_p2  ;;  %p936_p3 = por %p935_p13, %p934_p8 }
  0x76   : > { %v305_v43 = vld [vmem:[#allocation5 + $0xf8] sm:$0xff]  ;;  %v749_v44 = vpack.c.bf16 %v300_v41, %v298_v40  ;;  %v302_v46 = vld [vmem:[#allocation5 + $0xe0] sm:$0xff]  ;;  %v304_v47 = vld [vmem:[#allocation5 + $0xf0] sm:$0xff] }
  0x77   : > { %v751_v45 = vpack.c.bf16 %v305_v43, %v303_v42  ;;  %v753_v48 = vpack.c.bf16 %v304_v47, %v302_v46  ;;  %v272_v49 = vld [vmem:[%s1212_s6] sm:$0xff]  ;;  %v273_v50 = vld [vmem:[%s1212_s6 + $0x8] sm:$0xff]  ;;  %p937_p7 = pnand %p936_p3, %p930_p6 }
  0x78   : > { %734 = vmatpush1.bf16.msra.mxu0 %v733_v20  ;;  %v306_v56 = vld [vmem:[#allocation7] sm:$0xff] }
  0x79   : > { %736 = vmatprep.subr.bf16.mxu0 %v735_v21  ;;  %v694_v16 = vld [vmem:[%s1288_s3] ss:$0 sm:$0xff] }
  0x7a   : > { %v695_v18 = vld [vmem:[%s1289_s4] ss:$0 sm:$0xff] }
  0x7c   : > { %738 = vmatpush1.bf16.msra.mxu0 %v737_v26 }
  0x7d   : > { %740 = vmatprep.subr.bf16.mxu0 %v739_v27 }
  0x80   : > { %742 = vmatpush1.bf16.msra.mxu0 %v741_v32 }
  0x81   : > { %744 = vmatprep.subr.bf16.mxu0 %v743_v33 }
  0x84   : > { %746 = vmatpush1.bf16.msra.mxu0 %v745_v38 }
  0x85   : > { %748 = vmatprep.subr.bf16.mxu0 %v747_v39 }
  0x88   : > { %750 = vmatpush1.bf16.msra.mxu0 %v749_v44 }
  0x89   : > { %752 = vmatprep.subr.bf16.mxu0 %v751_v45 }
  0x8c   : > { %754 = vmatpush1.bf16.msra.mxu0 %v753_v48 }
  0x8f   : > { %372 = vmatmul.mubr.f32.vlgmr.msra.gmra.mrb[0].mxu0 %v272_v49 }
  0x90   : > { %377 = vmatprep.mubr.f32.mxu0 %v1006_v0 }
  0x93   : > { %378 = vmatmul.mubr.f32.gmra.mrb[2].mxu0 %v273_v50 }
 0x162   : > { %v373_v52 = vpop.f32.mrb[0].mxu0 }
 0x163   : > { %v375_v53 = vpop.f32.mrb[1].mxu0 }
 0x164   : > { %v756_v54 = vpack.c.bf16 %v375_v53, %v373_v52 }
 0x166   : > { %v379_v55 = vpop.f32.mrb[2].mxu0  ;;  %757 = vmatpush3.bf16.msra.mxu1 %v756_v54 }
 0x167   : > { %v381_v57 = vpop.f32.mrb[3].mxu0  ;;  %758 = vmatprep.subr.bf16.mxu1 %v1007_v51 }
 0x168   : > { %v759_v58 = vpack.c.bf16 %v381_v57, %v379_v55 }
 0x169   : > { %714 = vmatmul.mubr.msk.f32.vlgmr.msra.gmra.mrb[0].mxu1 %vm384_vm1, %v306_v56 }
 0x16a   : > { %760 = vmatpush3.bf16.msra.mxu1 %v759_v58  ;;  %720 = vmatprep.mubr.msk.f32.mxu1 %vm1008_vm0, %v1006_v0 }
 0x16d   : > { %721 = vmatmul.mubr.msk.f32.vlgmr.msra.gmra.mrb[2].mxu1 %vm384_vm1, %v306_v56 }
 0x23c   : > { %v454_v59 = vpop.f32.mrb[0].mxu1 }
 0x23d   : > { %v528_v60 = vadd.f32 %v454_v59, %v272_v49  ;;  %v715_v61 = vpop.f32.mrb[1].mxu1 }
 0x23f   : > { %530 = vadd.xlane.f32.xlu0 %v528_v60 }
 0x240   : > { %v524_v62 = vpop.f32.mrb[2].mxu1 }
 0x241   : > { %v529_v63 = vadd.f32 %v524_v62, %v273_v50  ;;  %v722_v1 = vpop.f32.mrb[3].mxu1 }
 0x243   : > { %532 = vadd.xlane.f32.xlu0 %v529_v63 }
 0x2cc   : > { %v531_v2 = vpop.xlane.xlu0 %530 }
 0x2cd   : > { %v535_v3 = vmul.f32 0.0078125, %v531_v2 }
 0x2cf   : > { %v537_v4 = vsub.f32 %v528_v60, %v535_v3 }
 0x2d0   : > { %v533_v5 = vpop.xlane.xlu0 %532 }
 0x2d1   : > { %v536_v6 = vmul.f32 0.0078125, %v533_v5  ;;  %v539_v7 = vmul.f32 %v537_v4, %v537_v4 }
 0x2d3   : > { %v538_v8 = vsub.f32 %v529_v63, %v536_v6  ;;  %541 = vadd.xlane.f32.xlu1 %v539_v7 }
 0x2d5   : > { %v540_v9 = vmul.f32 %v538_v8, %v538_v8 }
 0x2d7   : > { %543 = vadd.xlane.f32.xlu1 %v540_v9 }
 0x360   : > { %v542_v0 = vpop.xlane.xlu1 %541 }
 0x361   : > { %v545_v10 = vmul.f32 0.0078125, %v542_v0 }
 0x363   : > { %v547_v11 = vadd.f32 1e-12, %v545_v10 }
 0x364   : > { %v544_v12 = vpop.xlane.xlu1 %543 }
 0x365   : > { %837 = vrsqrt.f32 %v547_v11  ;;  %v546_v13 = vmul.f32 0.0078125, %v544_v12 }
 0x367   : > { %v548_v14 = vadd.f32 1e-12, %v546_v13 }
 0x369   : > { %839 = vrsqrt.f32 %v548_v14 }
 0x36f   : > { %v838_v15 = vpop.eup %837 }
 0x370   : > { %v551_v17 = vmul.f32 %v838_v15, %v537_v4 }
 0x372   : > { %v561_v19 = vmul.f32 %v694_v16, %v551_v17 }
 0x373   : > { %v840_v20 = vpop.eup %839 }
 0x374   : > { %v569_v21 = vadd.f32 %v695_v18, %v561_v19  ;;  %v552_v22 = vmul.f32 %v840_v20, %v538_v8 }
 0x376   : > { %v562_v23 = vmul.f32 %v694_v16, %v552_v22  ;;  %571 = vst [vmem:[%s269_s28] sm:$0xff] %v569_v21 }
 0x378   : > { %v570_v24 = vadd.f32 %v695_v18, %v562_v23 }
 0x37a   : > { %572 = vst [vmem:[%s269_s28 + $0x8] sm:$0xff] %v570_v24 }
 0x37b   : > { %940 = shalt.err (!%p937_p7)
}
 0x37c   : > { %s941_s6 = scalar_lea.hbm %s1240_s9, 256  ;;  %s945_s8 = scalar_lea.hbm %s1290_s5, 1024 }
 0x37d   : > { %p942_p9 = scmp.ne.s32.totalorder %s1240_s9, %s941_s6  ;;  %p946_p5 = scmp.lt.u32.totalorder %s1240_s9, %s1290_s5 }
 0x37e   : > { %p947_p10 = scmp.lt.u32.totalorder %s945_s8, %s941_s6  ;;  %p949_p1 = scmp.lt.u32.totalorder %s941_s6, %s1240_s9 }
 0x37f   : > { %p943_p12 = pnand %p942_p9, %p1154_p4 }
 0x380   : > { %p948_p11 = por %p947_p10, %p946_p5 }
 0x381   : > { %p944_p0 = pneg %p943_p12 }
 0x382   : > { %p950_p2 = por %p949_p1, %p948_p11 }
 0x384   : > { %p951_p6 = pnand %p950_p2, %p944_p0 }
 0x386   : > { %954 = shalt.err (!%p951_p6)
}
 0x387   : > { %s1010_s28 = smov 128   ;;  %s1011_s30 = smov 8  }
 0x388   : > { %771 = dma.vmem_to_hbm [thread:$0]  (%p1154_p4), %s1242_s23, 256, %s1240_s9, %s574_s12, %s1010_s28, %s1010_s28, %s1011_s30  }
 0x389 PF: > { %p793_p8 = scmp.ge.s32.totalorder %s997_s21, 2  ;;  %s602_s7 = sand.u32 1, %s985_s18  }
 0x38a   : > { %p1305_p13 = scmp.ne.s32.totalorder %s1295_s25, 0  ;;  %s603_s13 = scalar_lea.sflag [#allocation4], %s602_s7 }
 0x38c   : > { %p785_p3 = pnand %p793_p8, %p1305_p13 }
 0x38e   : > { %980 = dma.done.wait (!%p785_p3), %s603_s13, 256  }
 0x38f   : > { %982 = vsyncadd (!%p785_p3), %s603_s13, 4294967040  ;;  %p19_p7 = scmp.ge.s32.totalorder %s1144_s14, 6   ;;  %s1306_s18 = smov %s989_s19 }
 0x390   : > { %s1307_s19 = smov %s993_s20  ;;  %s1308_s20 = smov %s1160_s17 }
 0x391   : > { %s1309_s21 = smov %s1144_s14  ;;  %21 = sbr.rel (!%p19_p7) target bundleno = 6 (0x6), region = 93 }
 0x398   :  { %608 = vsyncpa [#allocation3], 1 }
 0x399   :  { %610 = vsyncpa [#allocation3 + $0x1], 1 }
 0x39a   :  { %611 = vsyncpa [#allocation6], 1 }
 0x39b   :  { %612 = vsyncpa [#allocation4], 1 }
 0x39c   :  { %614 = vsyncpa [#allocation4 + $0x1], 1 }

// kernel: tpu_custom_call.1
= control target key start
LH: loop header
LB: loop body
LE: loop exit
PB: predicated region body
PF: predicated region fallthrough
CT: control target
= control target key end

     0   :  { %10 = vsyncpa [#allocation3], 0  ;;  %s1285_s0 = inlined_call_operand.hbm [shape: f32[8,8,128], index: 0, kind: input, shape index: {}]   ;;  %s1286_s1 = inlined_call_operand.hbm [shape: f32[128,256], index: 1, kind: input, shape index: {}]   ;;  %s1287_s2 = inlined_call_operand.hbm [shape: f32[8,16], index: 2, kind: input, shape index: {}]   ;;  %s1288_s3 = inlined_call_operand.vmem [shape: f32[1,128], index: 3, kind: input, shape index: {}]   ;;  %s1289_s4 = inlined_call_operand.vmem [shape: f32[1,128], index: 4, kind: input, shape index: {}]   ;;  %s1290_s5 = inlined_call_operand.hbm [shape: f32[8,8,128], index: 5, kind: output, shape index: {}]  }
   0x1   :  { %12 = vsyncpa [#allocation3 + $0x1], 0 }
   0x2   :  { %13 = vsyncpa [#allocation6], 0 }
   0x3   :  { %14 = vsyncpa [#allocation4], 0 }
   0x4   :  { %16 = vsyncpa [#allocation4 + $0x1], 0  ;;  %s1042_s18 = smov 0   ;;  %s1044_s19 = smov 0  }
   0x5   :  { %s1046_s20 = smov 0   ;;  %s1048_s21 = smov 0  }
   0x6 LB: > { %s1063_s22 = sadd.s32 4294967295, %s997_s21   ;;  %s679_s23 = sadd.s32 4294967294, %s997_s21   ;;  %s997_s21 = sphi %s1048_s21, %s1309_s21   ;;  %s993_s20 = sphi %s1046_s20, %s1308_s20   ;;  %s989_s19 = sphi %s1044_s19, %s1307_s19   ;;  %s985_s18 = sphi %s1042_s18, %s1306_s18  }
   0x7   : > { %p42_p0 = scmp.ne.s32.totalorder %s989_s19, %s985_s18  ;;  %p1291_p1 = scmp.eq.s32.totalorder %s1063_s22, 0 }
   0x8   : > { %p156_p3 = scmp.eq.s32.totalorder %s679_s23, 3  ;;  %p680_p5 = scmp.ge.s32.totalorder %s997_s21, 1 }
   0x9   : > { %p1072_p4 = por %p1291_p1, %p42_p0  ;;  %p163_p7 = scmp.lt.s32.totalorder %s997_s21, 5 }
   0xa   : > { %p1077_p6 = por %p156_p3, %p42_p0  ;;  %s999_s27 = smov [#allocation5]  }
   0xb   : > { %s1294_s24 = scalar_select %p1072_p4, 1, 0 }
   0xc   : > { %s1295_s25 = scalar_select %p1077_p6, 1, 0 }
   0xd   : > { %p1082_p8 = pnand %p680_p5, %p163_p7  ;;  %s175_s28 = sshll.u32 %s999_s27, 4  ;;  %s176_s28 = int_to_ptr.vmem [resolvable:$true] %s175_s28 }
   0xe   : > { %s1000_s30 = smov [#allocation7]   ;;  %s841_s9 = scalar_lea.hbm %s1286_s1, 4096 }
   0xf   : > { %s1296_s26 = scalar_select %p1082_p8, 1, 0 }
  0x10   : > { %p773_p9 = pneg %p1082_p8  ;;  %s189_s6 = sshll.u32 %s1000_s30, 4  ;;  %s1094_s6 = int_to_ptr.vmem [resolvable:$true] %s189_s6 }
  0x11   : > { %p842_p11 = scmp.ne.s32.totalorder %s1286_s1, %s841_s9  ;;  %p848_p3 = scmp.lt.u32.totalorder %s841_s9, %s1286_s1 }
  0x12   : > { %p1090_p10 = pnand %p773_p9, %p1291_p1 }
  0x14   : > { %p843_p12 = pneg %p1090_p10 }
  0x16   : > { %p844_p13 = pnand %p843_p12, %p842_p11 }
  0x18   : > { %p845_p0 = pneg %p844_p13 }
  0x1a   : > { %p850_p5 = pnand %p848_p3, %p845_p0 }
  0x1c   : > { %853 = shalt.err (!%p850_p5)
}
  0x1d   : > { %s854_s14 = scalar_lea.vmem %s176_s28, 4096  ;;  %p862_p2 = scmp.lt.s32.totalorder %s176_s28, %s176_s28 }
  0x1e   : > { %p855_p7 = scmp.ne.s32.totalorder %s176_s28, %s854_s14  ;;  %p863_p6 = scmp.lt.s32.totalorder %s854_s14, %s854_s14 }
  0x20   : > { %p857_p9 = pnand %p855_p7, %p843_p12  ;;  %p864_p4 = por %p863_p6, %p862_p2 }
  0x22   : > { %p858_p1 = pneg %p857_p9 }
  0x24   : > { %p865_p8 = pnand %p864_p4, %p858_p1 }
  0x26   : > { %868 = shalt.err (!%p865_p8)
}
  0x27   : > { %s1001_s15 = smov 256   ;;  %s1002_s16 = smov 16  }
  0x28   : > { %776 = dma.hbm_to_vmem [thread:$0]  (!%p1090_p10), %s1286_s1, 4096, %s176_s28, [#allocation6], %s1001_s15, %s1001_s15, %s1002_s16  }
  0x29   : > { %s869_s7 = scalar_lea.hbm %s1287_s2, 128 }
  0x2a   : > { %p870_p11 = scmp.ne.s32.totalorder %s1287_s2, %s869_s7  ;;  %p876_p4 = scmp.lt.u32.totalorder %s869_s7, %s1287_s2 }
  0x2c   : > { %p872_p1 = pnand %p870_p11, %p843_p12 }
  0x2e   : > { %p873_p2 = pneg %p872_p1 }
  0x30   : > { %p878_p6 = pnand %p876_p4, %p873_p2 }
  0x32   : > { %881 = shalt.err (!%p878_p6)
}
  0x33   : > { %s882_s28 = scalar_lea.vmem %s1094_s6, 128  ;;  %p890_p3 = scmp.lt.s32.totalorder %s1094_s6, %s1094_s6 }
  0x34   : > { %p883_p8 = scmp.ne.s32.totalorder %s1094_s6, %s882_s28  ;;  %p891_p5 = scmp.lt.s32.totalorder %s882_s28, %s882_s28 }
  0x36   : > { %p885_p13 = pnand %p883_p8, %p843_p12  ;;  %p892_p7 = por %p891_p5, %p890_p3 }
  0x38   : > { %p886_p0 = pneg %p885_p13 }
  0x3a   : > { %p893_p9 = pnand %p892_p7, %p886_p0 }
  0x3c   : > { %896 = shalt.err (!%p893_p9)
}
  0x3d   : > { %779 = dma.hbm_to_vmem [thread:$0]  (!%p1090_p10), %s1287_s2, 128, %s1094_s6, [#allocation6]  }
  0x3e   : > { %s1144_s14 = sadd.s32 1, %s997_s21   ;;  %s29_s29 = sadd.s32 1, %s993_s20 }
  0x3f   : > { %s26_s15 = ssub.s32 %s997_s21, %s1144_s14  ;;  %p36_p12 = scmp.ne.s32.totalorder %s993_s20, %s989_s19 }
  0x40   : > { %p27_p11 = scmp.eq.s32.totalorder %s26_s15, 0  ;;  %p37_p1 = scmp.eq.s32.totalorder %s997_s21, 0 }
  0x41   : > { %p1298_p2 = scmp.eq.s32.totalorder %s1063_s22, 3  ;;  %p790_p6 = scmp.lt.s32.totalorder %s997_s21, 4 }
  0x42   : > { %s1160_s17 = scalar_select %p27_p11, %s993_s20, %s29_s29  }
  0x43   : > { %p1154_p4 = por %p1298_p2, %p36_p12  ;;  %p38_p8 = por %p37_p1, %p36_p12 }
  0x44   : > { %s206_s23 = sand.u32 1, %s993_s20   ;;  %s701_s6 = sshll.u32 %s997_s21, 8 }
  0x45   : > { %s684_s27 = sshll.u32 %s206_s23, 4  ;;  %s1167_s8 = scalar_lea.hbm %s1285_s0, %s701_s6 }
  0x46   : > { %s210_s9 = scalar_lea.vmem [#allocation2], %s684_s27  ;;  %p1171_p10 = pnand %p790_p6, %p38_p8 }
  0x47   : > { %s217_s10 = sshll.u32 %s210_s9, 4  ;;  %s1175_s28 = scalar_lea.sflag [#allocation3], %s206_s23  ;;  %s1169_s10 = int_to_ptr.vmem [resolvable:$true] %s217_s10 }
  0x48   : > { %s897_s12 = scalar_lea.hbm %s1167_s8, 256  ;;  %p899_p0 = pneg %p1171_p10 }
  0x49   : > { %p898_p13 = scmp.ne.s32.totalorder %s1167_s8, %s897_s12  ;;  %s902_s15 = scalar_lea.hbm %s1285_s0, 1024 }
  0x4a   : > { %p903_p7 = scmp.lt.u32.totalorder %s1167_s8, %s1285_s0  ;;  %p904_p9 = scmp.lt.u32.totalorder %s902_s15, %s897_s12 }
  0x4b   : > { %p900_p3 = pnand %p899_p0, %p898_p13  ;;  %p906_p11 = scmp.lt.u32.totalorder %s897_s12, %s1167_s8 }
  0x4c   : > { %p905_p12 = por %p904_p9, %p903_p7 }
  0x4d   : > { %p901_p5 = pneg %p900_p3 }
  0x4e   : > { %p907_p1 = por %p906_p11, %p905_p12 }
  0x50   : > { %p908_p2 = pnand %p907_p1, %p901_p5 }
  0x52   : > { %911 = shalt.err (!%p908_p2)
}
  0x53   : > { %s912_s23 = scalar_lea.vmem %s1169_s10, 256  ;;  %s1003_s30 = smov [#allocation2]  }
  0x54   : > { %p913_p6 = scmp.ne.s32.totalorder %s1169_s10, %s912_s23  ;;  %s917_s7 = sshll.u32 %s1003_s30, 4  ;;  %s918_s7 = int_to_ptr.vmem [resolvable:$false] %s917_s7 }
  0x55   : > { %s919_s9 = scalar_lea.vmem %s918_s7, 512  ;;  %p920_p3 = scmp.lt.s32.totalorder %s1169_s10, %s918_s7 }
  0x56   : > { %p915_p8 = pnand %p913_p6, %p899_p0  ;;  %p921_p7 = scmp.lt.s32.totalorder %s919_s9, %s912_s23 }
  0x58   : > { %p916_p13 = pneg %p915_p8  ;;  %p922_p9 = por %p921_p7, %p920_p3 }
  0x5a   : > { %p923_p12 = pnand %p922_p9, %p916_p13 }
  0x5c   : > { %926 = shalt.err (!%p923_p12)
}
  0x5d   : > { %s1004_s12 = smov 128   ;;  %s1005_s13 = smov 8  }
  0x5e   : > { %783 = dma.hbm_to_vmem [thread:$0]  (!%p1171_p10), %s1167_s8, 256, %s1169_s10, %s1175_s28, %s1004_s12, %s1004_s12, %s1005_s13  }
  0x5f   : > { %p1301_p0 = scmp.ne.s32.totalorder %s1296_s26, 0 }
  0x60   : > { %s1206_s29 = sand.u32 (!%p1301_p0), 1, %s989_s19   ;;  %p1302_p5 = scmp.ne.s32.totalorder (!%p1301_p0), %s1294_s24, 0 }
  0x61   : > { %229 = sbr.rel (%p1301_p0) target bundleno = 905 (0x389), region = 40  ;;  %s688_s15 = sshll.u32 (!%p1301_p0), %s1206_s29, 4 }
  0x62   : > { %s232_s27 = scalar_lea.sflag (!%p1301_p0), [#allocation3], %s1206_s29  ;;  %s1212_s6 = scalar_lea.vmem (!%p1301_p0), [#allocation2], %s688_s15 }
  0x68   : > { %972 = dma.done.wait (%p1302_p5), %s232_s27, 256  }
  0x69   : > { %974 = vsyncadd (%p1302_p5), %s232_s27, 4294967040  ;;  %p1303_p10 = scmp.eq.s32.totalorder %s1063_s22, 0 }
  0x6b   : > { %976 = dma.done.wait (%p1303_p10), [#allocation6], 4224   ;;  %p1304_p11 = pmov %p1303_p10 }
  0x6c   : > { %v1006_v0 = vmov 0.0   ;;  %v275_v1 = vld [vmem:[#allocation5 + $0x8] sm:$0xff]  ;;  %v277_v2 = vld [vmem:[#allocation5 + $0x18] sm:$0xff]  ;;  %v274_v3 = vld [vmem:[#allocation5] sm:$0xff]  ;;  %v1007_v51 = vmov 0.0|0.0   ;;  %vm1008_vm0 = vmmov 0  }
  0x6d   : > { %978 = vsyncadd (%p1304_p11), [#allocation6], 4294963072  ;;  %371 = vmatprep.mubr.f32.mxu0 %v1006_v0  ;;  %v723_v4 = vpack.c.bf16 %v277_v2, %v275_v1  ;;  %v276_v5 = vld [vmem:[#allocation5 + $0x10] sm:$0xff]  ;;  %v279_v6 = vld [vmem:[#allocation5 + $0x28] sm:$0xff]  ;;  %755 = vmatprep.subr.bf16.mxu1 %v1007_v51  ;;  %vm384_vm1 = vcmask 130048   ;;  %s702_s11 = sshll.u32 %s1063_s22, 8 }
  0x6e   : > { %v281_v7 = vld [vmem:[#allocation5 + $0x38] sm:$0xff]  ;;  %v725_v8 = vpack.c.bf16 %v276_v5, %v274_v3  ;;  %v278_v10 = vld [vmem:[#allocation5 + $0x20] sm:$0xff]  ;;  %v280_v11 = vld [vmem:[#allocation5 + $0x30] sm:$0xff]  ;;  %713 = vmatprep.mubr.msk.f32.mxu1 %vm1008_vm0, %v1006_v0  ;;  %s269_s28 = scalar_lea.vmem [#allocation8], %s688_s15  ;;  %s1240_s9 = scalar_lea.hbm %s1290_s5, %s702_s11 }
  0x6f   : > { %v727_v9 = vpack.c.bf16 %v281_v7, %v279_v6  ;;  %v283_v12 = vld [vmem:[#allocation5 + $0x48] sm:$0xff]  ;;  %724 = vmatprep.subr.bf16.mxu0 %v723_v4  ;;  %v285_v13 = vld [vmem:[#allocation5 + $0x58] sm:$0xff]  ;;  %v729_v14 = vpack.c.bf16 %v280_v11, %v278_v10  ;;  %v282_v16 = vld [vmem:[#allocation5 + $0x40] sm:$0xff]  ;;  %s587_s23 = sshll.u32 %s269_s28, 4  ;;  %s574_s12 = scalar_lea.sflag [#allocation4], %s1206_s29  ;;  %s1242_s23 = int_to_ptr.vmem [resolvable:$true] %s587_s23 }
  0x70   : > { %726 = vmatpush1.bf16.msra.mxu0 %v725_v8  ;;  %v731_v15 = vpack.c.bf16 %v285_v13, %v283_v12  ;;  %v284_v17 = vld [vmem:[#allocation5 + $0x50] sm:$0xff]  ;;  %v287_v18 = vld [vmem:[#allocation5 + $0x68] sm:$0xff]  ;;  %v289_v19 = vld [vmem:[#allocation5 + $0x78] sm:$0xff]  ;;  %s927_s13 = scalar_lea.vmem %s1242_s23, 256  ;;  %s1009_s22 = smov [#allocation8]  }
  0x71   : > { %728 = vmatprep.subr.bf16.mxu0 %v727_v9  ;;  %v733_v20 = vpack.c.bf16 %v284_v17, %v282_v16  ;;  %v735_v21 = vpack.c.bf16 %v289_v19, %v287_v18  ;;  %v286_v22 = vld [vmem:[#allocation5 + $0x60] sm:$0xff]  ;;  %v288_v23 = vld [vmem:[#allocation5 + $0x70] sm:$0xff]  ;;  %v291_v24 = vld [vmem:[#allocation5 + $0x88] sm:$0xff]  ;;  %p928_p1 = scmp.ne.s32.totalorder %s1242_s23, %s927_s13  ;;  %s931_s15 = sshll.u32 %s1009_s22, 4  ;;  %s932_s15 = int_to_ptr.vmem [resolvable:$false] %s931_s15 }
  0x72   : > { %v293_v25 = vld [vmem:[#allocation5 + $0x98] sm:$0xff]  ;;  %v737_v26 = vpack.c.bf16 %v288_v23, %v286_v22  ;;  %v290_v28 = vld [vmem:[#allocation5 + $0x80] sm:$0xff]  ;;  %v292_v29 = vld [vmem:[#allocation5 + $0x90] sm:$0xff]  ;;  %s933_s27 = scalar_lea.vmem %s932_s15, 512  ;;  %p934_p8 = scmp.lt.s32.totalorder %s1242_s23, %s932_s15 }
  0x73   : > { %v739_v27 = vpack.c.bf16 %v293_v25, %v291_v24  ;;  %v295_v30 = vld [vmem:[#allocation5 + $0xa8] sm:$0xff]  ;;  %v297_v31 = vld [vmem:[#allocation5 + $0xb8] sm:$0xff]  ;;  %v741_v32 = vpack.c.bf16 %v292_v29, %v290_v28  ;;  %v294_v34 = vld [vmem:[#allocation5 + $0xa0] sm:$0xff]  ;;  %p929_p2 = pnand %p928_p1, %p1154_p4  ;;  %p935_p13 = scmp.lt.s32.totalorder %s933_s27, %s927_s13 }
  0x74   : > { %730 = vmatpush1.bf16.msra.mxu0 %v729_v14  ;;  %v743_v33 = vpack.c.bf16 %v297_v31, %v295_v30  ;;  %v296_v35 = vld [vmem:[#allocation5 + $0xb0] sm:$0xff]  ;;  %v299_v36 = vld [vmem:[#allocation5 + $0xc8] sm:$0xff]  ;;  %v301_v37 = vld [vmem:[#allocation5 + $0xd8] sm:$0xff] }
  0x75   : > { %732 = vmatprep.subr.bf16.mxu0 %v731_v15  ;;  %v745_v38 = vpack.c.bf16 %v296_v35, %v294_v34  ;;  %v747_v39 = vpack.c.bf16 %v301_v37, %v299_v36  ;;  %v298_v40 = vld [vmem:[#allocation5 + $0xc0] sm:$0xff]  ;;  %v300_v41 = vld [vmem:[#allocation5 + $0xd0] sm:$0xff]  ;;  %v303_v42 = vld [vmem:[#allocation5 + $0xe8] sm:$0xff]  ;;  %p930_p6 = pneg %p929_p2  ;;  %p936_p3 = por %p935_p13, %p934_p8 }
  0x76   : > { %v305_v43 = vld [vmem:[#allocation5 + $0xf8] sm:$0xff]  ;;  %v749_v44 = vpack.c.bf16 %v300_v41, %v298_v40  ;;  %v302_v46 = vld [vmem:[#allocation5 + $0xe0] sm:$0xff]  ;;  %v304_v47 = vld [vmem:[#allocation5 + $0xf0] sm:$0xff] }
  0x77   : > { %v751_v45 = vpack.c.bf16 %v305_v43, %v303_v42  ;;  %v753_v48 = vpack.c.bf16 %v304_v47, %v302_v46  ;;  %v272_v49 = vld [vmem:[%s1212_s6] sm:$0xff]  ;;  %v273_v50 = vld [vmem:[%s1212_s6 + $0x8] sm:$0xff]  ;;  %p937_p7 = pnand %p936_p3, %p930_p6 }
  0x78   : > { %734 = vmatpush1.bf16.msra.mxu0 %v733_v20  ;;  %v306_v56 = vld [vmem:[#allocation7] sm:$0xff] }
  0x79   : > { %736 = vmatprep.subr.bf16.mxu0 %v735_v21  ;;  %v694_v16 = vld [vmem:[%s1288_s3] ss:$0 sm:$0xff] }
  0x7a   : > { %v695_v18 = vld [vmem:[%s1289_s4] ss:$0 sm:$0xff] }
  0x7c   : > { %738 = vmatpush1.bf16.msra.mxu0 %v737_v26 }
  0x7d   : > { %740 = vmatprep.subr.bf16.mxu0 %v739_v27 }
  0x80   : > { %742 = vmatpush1.bf16.msra.mxu0 %v741_v32 }
  0x81   : > { %744 = vmatprep.subr.bf16.mxu0 %v743_v33 }
  0x84   : > { %746 = vmatpush1.bf16.msra.mxu0 %v745_v38 }
  0x85   : > { %748 = vmatprep.subr.bf16.mxu0 %v747_v39 }
  0x88   : > { %750 = vmatpush1.bf16.msra.mxu0 %v749_v44 }
  0x89   : > { %752 = vmatprep.subr.bf16.mxu0 %v751_v45 }
  0x8c   : > { %754 = vmatpush1.bf16.msra.mxu0 %v753_v48 }
  0x8f   : > { %372 = vmatmul.mubr.f32.vlgmr.msra.gmra.mrb[0].mxu0 %v272_v49 }
  0x90   : > { %377 = vmatprep.mubr.f32.mxu0 %v1006_v0 }
  0x93   : > { %378 = vmatmul.mubr.f32.gmra.mrb[2].mxu0 %v273_v50 }
 0x162   : > { %v373_v52 = vpop.f32.mrb[0].mxu0 }
 0x163   : > { %v375_v53 = vpop.f32.mrb[1].mxu0 }
 0x164   : > { %v756_v54 = vpack.c.bf16 %v375_v53, %v373_v52 }
 0x166   : > { %v379_v55 = vpop.f32.mrb[2].mxu0  ;;  %757 = vmatpush3.bf16.msra.mxu1 %v756_v54 }
 0x167   : > { %v381_v57 = vpop.f32.mrb[3].mxu0  ;;  %758 = vmatprep.subr.bf16.mxu1 %v1007_v51 }
 0x168   : > { %v759_v58 = vpack.c.bf16 %v381_v57, %v379_v55 }
 0x169   : > { %714 = vmatmul.mubr.msk.f32.vlgmr.msra.gmra.mrb[0].mxu1 %vm384_vm1, %v306_v56 }
 0x16a   : > { %760 = vmatpush3.bf16.msra.mxu1 %v759_v58  ;;  %720 = vmatprep.mubr.msk.f32.mxu1 %vm1008_vm0, %v1006_v0 }
 0x16d   : > { %721 = vmatmul.mubr.msk.f32.vlgmr.msra.gmra.mrb[2].mxu1 %vm384_vm1, %v306_v56 }
 0x23c   : > { %v454_v59 = vpop.f32.mrb[0].mxu1 }
 0x23d   : > { %v528_v60 = vadd.f32 %v454_v59, %v272_v49  ;;  %v715_v61 = vpop.f32.mrb[1].mxu1 }
 0x23f   : > { %530 = vadd.xlane.f32.xlu0 %v528_v60 }
 0x240   : > { %v524_v62 = vpop.f32.mrb[2].mxu1 }
 0x241   : > { %v529_v63 = vadd.f32 %v524_v62, %v273_v50  ;;  %v722_v1 = vpop.f32.mrb[3].mxu1 }
 0x243   : > { %532 = vadd.xlane.f32.xlu0 %v529_v63 }
 0x2cc   : > { %v531_v2 = vpop.xlane.xlu0 %530 }
 0x2cd   : > { %v535_v3 = vmul.f32 0.0078125, %v531_v2 }
 0x2cf   : > { %v537_v4 = vsub.f32 %v528_v60, %v535_v3 }
 0x2d0   : > { %v533_v5 = vpop.xlane.xlu0 %532 }
 0x2d1   : > { %v536_v6 = vmul.f32 0.0078125, %v533_v5  ;;  %v539_v7 = vmul.f32 %v537_v4, %v537_v4 }
 0x2d3   : > { %v538_v8 = vsub.f32 %v529_v63, %v536_v6  ;;  %541 = vadd.xlane.f32.xlu1 %v539_v7 }
 0x2d5   : > { %v540_v9 = vmul.f32 %v538_v8, %v538_v8 }
 0x2d7   : > { %543 = vadd.xlane.f32.xlu1 %v540_v9 }
 0x360   : > { %v542_v0 = vpop.xlane.xlu1 %541 }
 0x361   : > { %v545_v10 = vmul.f32 0.0078125, %v542_v0 }
 0x363   : > { %v547_v11 = vadd.f32 1e-12, %v545_v10 }
 0x364   : > { %v544_v12 = vpop.xlane.xlu1 %543 }
 0x365   : > { %837 = vrsqrt.f32 %v547_v11  ;;  %v546_v13 = vmul.f32 0.0078125, %v544_v12 }
 0x367   : > { %v548_v14 = vadd.f32 1e-12, %v546_v13 }
 0x369   : > { %839 = vrsqrt.f32 %v548_v14 }
 0x36f   : > { %v838_v15 = vpop.eup %837 }
 0x370   : > { %v551_v17 = vmul.f32 %v838_v15, %v537_v4 }
 0x372   : > { %v561_v19 = vmul.f32 %v694_v16, %v551_v17 }
 0x373   : > { %v840_v20 = vpop.eup %839 }
 0x374   : > { %v569_v21 = vadd.f32 %v695_v18, %v561_v19  ;;  %v552_v22 = vmul.f32 %v840_v20, %v538_v8 }
 0x376   : > { %v562_v23 = vmul.f32 %v694_v16, %v552_v22  ;;  %571 = vst [vmem:[%s269_s28] sm:$0xff] %v569_v21 }
 0x378   : > { %v570_v24 = vadd.f32 %v695_v18, %v562_v23 }
 0x37a   : > { %572 = vst [vmem:[%s269_s28 + $0x8] sm:$0xff] %v570_v24 }
 0x37b   : > { %940 = shalt.err (!%p937_p7)
}
 0x37c   : > { %s941_s6 = scalar_lea.hbm %s1240_s9, 256  ;;  %s945_s8 = scalar_lea.hbm %s1290_s5, 1024 }
 0x37d   : > { %p942_p9 = scmp.ne.s32.totalorder %s1240_s9, %s941_s6  ;;  %p946_p5 = scmp.lt.u32.totalorder %s1240_s9, %s1290_s5 }
 0x37e   : > { %p947_p10 = scmp.lt.u32.totalorder %s945_s8, %s941_s6  ;;  %p949_p1 = scmp.lt.u32.totalorder %s941_s6, %s1240_s9 }
 0x37f   : > { %p943_p12 = pnand %p942_p9, %p1154_p4 }
 0x380   : > { %p948_p11 = por %p947_p10, %p946_p5 }
 0x381   : > { %p944_p0 = pneg %p943_p12 }
 0x382   : > { %p950_p2 = por %p949_p1, %p948_p11 }
 0x384   : > { %p951_p6 = pnand %p950_p2, %p944_p0 }
 0x386   : > { %954 = shalt.err (!%p951_p6)
}
 0x387   : > { %s1010_s28 = smov 128   ;;  %s1011_s30 = smov 8  }
 0x388   : > { %771 = dma.vmem_to_hbm [thread:$0]  (%p1154_p4), %s1242_s23, 256, %s1240_s9, %s574_s12, %s1010_s28, %s1010_s28, %s1011_s30  }
 0x389 PF: > { %p793_p8 = scmp.ge.s32.totalorder %s997_s21, 2  ;;  %s602_s7 = sand.u32 1, %s985_s18  }
 0x38a   : > { %p1305_p13 = scmp.ne.s32.totalorder %s1295_s25, 0  ;;  %s603_s13 = scalar_lea.sflag [#allocation4], %s602_s7 }
 0x38c   : > { %p785_p3 = pnand %p793_p8, %p1305_p13 }
 0x38e   : > { %980 = dma.done.wait (!%p785_p3), %s603_s13, 256  }
 0x38f   : > { %982 = vsyncadd (!%p785_p3), %s603_s13, 4294967040  ;;  %p19_p7 = scmp.ge.s32.totalorder %s1144_s14, 6   ;;  %s1306_s18 = smov %s989_s19 }
 0x390   : > { %s1307_s19 = smov %s993_s20  ;;  %s1308_s20 = smov %s1160_s17 }
 0x391   : > { %s1309_s21 = smov %s1144_s14  ;;  %21 = sbr.rel (!%p19_p7) target bundleno = 6 (0x6), region = 93 }
 0x398   :  { %608 = vsyncpa [#allocation3], 1 }
 0x399   :  { %610 = vsyncpa [#allocation3 + $0x1], 1 }
 0x39a   :  { %611 = vsyncpa [#allocation6], 1 }
 0x39b   :  { %612 = vsyncpa [#allocation4], 1 }
 0x39c   :  { %614 = vsyncpa [#allocation4 + $0x1], 1 }

</bundles_post_ra>
